<compile_context>
chip_gen: v7x
topology: tpu7x:2x2x1
jax: 0.10.0
libtpu: 0.0.40
codegen_flags: <defaults>
</compile_context>

<pallas_src>
import functools

import jax
import jax.numpy as jnp
from jax import lax
from jax.experimental import pallas as pl
from jax.experimental.pallas import tpu as pltpu


def _round_up(n, m):
    return ((n + m - 1) // m) * m


def _pad_to(a, shape):
    pads = [(0, s - d) for d, s in zip(a.shape, shape)]
    return jnp.pad(a, pads)


# ----------------------------------------------------------------------------
# Kernel 1: generic row-tiled matmul + bias  (used for the hoisted input
# projection and for the final fc layer).
# ----------------------------------------------------------------------------
def _matmul_bias_kernel(x_ref, w_ref, b_ref, o_ref):
    o_ref[...] = (jnp.dot(x_ref[...], w_ref[...],
                          preferred_element_type=jnp.float32)
                  + b_ref[...]).astype(o_ref.dtype)


# ----------------------------------------------------------------------------
# Kernel 2: the GRU recurrence over a chunk of T timesteps per grid step.
#   gi_ref   : (T, Bp, 3*Hp)  precomputed x-projection (+ folded biases)
#   whh_ref  : (Hp, 3*Hp)     hidden weights, gate-padded, row-major
#   bhhn_ref : (1, Hp)        b_hh for the n gate (needed inside r * (...))
#   h_out_ref: (Bp, Hp)       final hidden state (written on last chunk)
#   h_scratch: (Bp, Hp)       hidden-state carry across grid steps
# ----------------------------------------------------------------------------
def _gru_recurrent_kernel(gi_ref, whh_ref, bhhn_ref, h_out_ref, h_scratch,
                          *, T, Hp, S, Sp):
    c = pl.program_id(0)

    @pl.when(c == 0)
    def _():
        h_scratch[...] = jnp.zeros_like(h_scratch)

    whh = whh_ref[...]        # hoist loads out of the unrolled loop
    bhh_n = bhhn_ref[...]

    def step(i, h):
        gi_t = gi_ref[i]                      # (Bp, 3Hp), lane-aligned gates
        gh = jnp.dot(h, whh, preferred_element_type=jnp.float32)
        r = jax.nn.sigmoid(gi_t[:, 0:Hp] + gh[:, 0:Hp])
        z = jax.nn.sigmoid(gi_t[:, Hp:2 * Hp] + gh[:, Hp:2 * Hp])
        n = jnp.tanh(gi_t[:, 2 * Hp:3 * Hp] + r * (gh[:, 2 * Hp:3 * Hp] + bhh_n))
        h_new = n + z * (h - n)               # == (1-z)*n + z*h
        if Sp != S:                           # mask padded tail timesteps
            h_new = jnp.where(c * T + i < S, h_new, h)
        return h_new

    h = lax.fori_loop(0, T, step, h_scratch[...], unroll=True)
    h_scratch[...] = h

    @pl.when(c == pl.num_programs(0) - 1)
    def _():
        h_out_ref[...] = h.astype(h_out_ref.dtype)


# ----------------------------------------------------------------------------
# Wrapper
# ----------------------------------------------------------------------------
def gru_model_forward(x, params):
    """x: (B, S, I) float32. Returns (1, B, O) to match PyTorch fc(h)."""
    B, S, I = x.shape
    w_ih, w_hh, b_ih, b_hh, w_fc, b_fc = (
        params["w_ih"], params["w_hh"], params["b_ih"],
        params["b_hh"], params["w_fc"], params["b_fc"])
    H = w_hh.shape[1]
    O = w_fc.shape[0]

    Hp = _round_up(H, 128)          # lane-aligned hidden width
    Op = _round_up(O, 128)          # lane-dense fc output
    Bp = _round_up(B, 8)            # sublane-aligned batch
    T = min(S, 16)                  # timesteps per grid step
    Sp = _round_up(S, T)

    # --- Gate-padded weight / bias layout (each gate owns an Hp-wide slab) ---
    wih_p = jnp.concatenate(
        [_pad_to(w_ih[g * H:(g + 1) * H].T, (I, Hp)) for g in range(3)],
        axis=1)                                        # (I, 3Hp)
    whh_p = jnp.concatenate(
        [_pad_to(w_hh[g * H:(g + 1) * H].T, (Hp, Hp)) for g in range(3)],
        axis=1)                                        # (Hp, 3Hp)
    # Fold b_ih + b_hh for r and z; keep only b_ih for n (b_hh_n applied
    # inside the kernel, under the r * (...) term).
    b_comb = jnp.concatenate([
        _pad_to((b_ih[0:H] + b_hh[0:H]).reshape(1, H), (1, Hp)),
        _pad_to((b_ih[H:2 * H] + b_hh[H:2 * H]).reshape(1, H), (1, Hp)),
        _pad_to(b_ih[2 * H:3 * H].reshape(1, H), (1, Hp))], axis=1)  # (1, 3Hp)
    bhh_n = _pad_to(b_hh[2 * H:3 * H].reshape(1, H), (1, Hp))        # (1, Hp)
    wfc_p = _pad_to(w_fc.T, (Hp, Op))                                # (Hp, Op)
    bfc_p = _pad_to(b_fc.reshape(1, O), (1, Op))                     # (1, Op)

    # --- Hoisted input projection: one big (S*Bp, I) @ (I, 3Hp) matmul ------
    x_p = _pad_to(x, (Bp, S, I))
    x_tm = jnp.transpose(x_p, (1, 0, 2))               # time-major (S, Bp, I)
    x2d = x_tm.reshape(S * Bp, I)
    rows = S * Bp
    Rt = min(256, rows)                                # rows is a multiple of 8
    Rp = _round_up(rows, Rt)
    x2d_p = _pad_to(x2d, (Rp, I))

    gi2d = pl.pallas_call(
        _matmul_bias_kernel,
        out_shape=jax.ShapeDtypeStruct((Rp, 3 * Hp), jnp.float32),
        grid_spec=pltpu.PrefetchScalarGridSpec(
            num_scalar_prefetch=0,
            grid=(Rp // Rt,),
            in_specs=[
                pl.BlockSpec((Rt, I), lambda i: (i, 0)),
                pl.BlockSpec((I, 3 * Hp), lambda i: (0, 0)),
                pl.BlockSpec((1, 3 * Hp), lambda i: (0, 0)),
            ],
            out_specs=pl.BlockSpec((Rt, 3 * Hp), lambda i: (i, 0))),
        compiler_params=pltpu.CompilerParams(
            dimension_semantics=("parallel",)),
    )(x2d_p, wih_p, b_comb)

    gi = gi2d[:rows].reshape(S, Bp, 3 * Hp)
    gi = _pad_to(gi, (Sp, Bp, 3 * Hp))                 # pad time to chunk mult

    # --- Recurrent kernel: grid over time chunks ---------------------------
    rec_kernel = functools.partial(_gru_recurrent_kernel,
                                   T=T, Hp=Hp, S=S, Sp=Sp)
    h_final = pl.pallas_call(
        rec_kernel,
        out_shape=jax.ShapeDtypeStruct((Bp, Hp), jnp.float32),
        grid_spec=pltpu.PrefetchScalarGridSpec(
            num_scalar_prefetch=0,
            grid=(Sp // T,),
            in_specs=[
                pl.BlockSpec((T, Bp, 3 * Hp), lambda c: (c, 0, 0)),  # gi chunk
                pl.BlockSpec((Hp, 3 * Hp), lambda c: (0, 0)),        # W_hh
                pl.BlockSpec((1, Hp), lambda c: (0, 0)),             # b_hh_n
            ],
            out_specs=pl.BlockSpec((Bp, Hp), lambda c: (0, 0)),
            scratch_shapes=[pltpu.VMEM((Bp, Hp), jnp.float32)]),
        compiler_params=pltpu.CompilerParams(
            dimension_semantics=("arbitrary",)),       # sequential recurrence
    )(gi, whh_p, bhh_n)

    # --- Final Linear on the last hidden state (separate tiny kernel) ------
    out_p = pl.pallas_call(
        _matmul_bias_kernel,
        out_shape=jax.ShapeDtypeStruct((Bp, Op), jnp.float32),
        grid_spec=pltpu.PrefetchScalarGridSpec(
            num_scalar_prefetch=0,
            grid=(1,),
            in_specs=[
                pl.BlockSpec((Bp, Hp), lambda i: (0, 0)),
                pl.BlockSpec((Hp, Op), lambda i: (0, 0)),
                pl.BlockSpec((1, Op), lambda i: (0, 0)),
            ],
            out_specs=pl.BlockSpec((Bp, Op), lambda i: (0, 0))),
    )(h_final, wfc_p, bfc_p)

    out = out_p[:B, :O]
    return out[None, :, :]   # (1, B, O), mirroring fc applied to h (1, B, H)


def init_params(key, input_dim, hidden_dim, output_dim):
    """Deterministic init mimicking PyTorch's uniform(-1/sqrt(H), 1/sqrt(H))."""
    ks = jax.random.split(key, 6)
    kgru = 1.0 / jnp.sqrt(hidden_dim)
    kfc = 1.0 / jnp.sqrt(hidden_dim)
    return {
        "w_ih": jax.random.uniform(ks[0], (3 * hidden_dim, input_dim), jnp.float32, -kgru, kgru),
        "w_hh": jax.random.uniform(ks[1], (3 * hidden_dim, hidden_dim), jnp.float32, -kgru, kgru),
        "b_ih": jax.random.uniform(ks[2], (3 * hidden_dim,), jnp.float32, -kgru, kgru),
        "b_hh": jax.random.uniform(ks[3], (3 * hidden_dim,), jnp.float32, -kgru, kgru),
        "w_fc": jax.random.uniform(ks[4], (output_dim, hidden_dim), jnp.float32, -kfc, kfc),
        "b_fc": jax.random.uniform(ks[5], (output_dim,), jnp.float32, -kfc, kfc),
    }


def _reference_forward(x, params):
    """Pure-JAX reference of the PyTorch GRU forward for validation."""
    B, S, I = x.shape
    H = params["w_hh"].shape[1]
    w_ih, w_hh, b_ih, b_hh = params["w_ih"], params["w_hh"], params["b_ih"], params["b_hh"]
    h = jnp.zeros((B, H), jnp.float32)
    for t in range(S):
        x_t = x[:, t, :]
        gi = x_t @ w_ih.T + b_ih
        gh = h @ w_hh.T + b_hh
        i_r, i_z, i_n = gi[:, :H], gi[:, H:2 * H], gi[:, 2 * H:]
        h_r, h_z, h_n = gh[:, :H], gh[:, H:2 * H], gh[:, 2 * H:]
        r = jax.nn.sigmoid(i_r + h_r)
        z = jax.nn.sigmoid(i_z + h_z)
        n = jnp.tanh(i_n + r * h_n)
        h = (1.0 - z) * n + z * h
    out = h @ params["w_fc"].T + params["b_fc"]
    return out[None, :, :]


if __name__ == "__main__":
    B, S, I, H, O = 4, 8, 16, 32, 8
    key = jax.random.PRNGKey(0)
    kx, kp = jax.random.split(key)
    x = jax.random.normal(kx, (B, S, I), jnp.float32)
    params = init_params(kp, I, H, O)

    out = gru_model_forward(x, params)
    jax.block_until_ready(out)

    ref = _reference_forward(x, params)
    assert out.shape == (1, B, O), out.shape
    assert jnp.allclose(out, ref, atol=1e-5, rtol=1e-5), \
        f"max err {jnp.max(jnp.abs(out - ref))}"
    print("KERNEL_OK")
</pallas_src>

<mosaic_0001>
module attributes {stable_mosaic.version = 11 : i64} {
  func.func @_matmul_bias_kernel(%arg0: i32, %arg1: memref<64x16xf32, #tpu.memory_space<vmem>>, %arg2: memref<16x384xf32, #tpu.memory_space<vmem>>, %arg3: memref<1x384xf32, #tpu.memory_space<vmem>>, %arg4: memref<64x384xf32, #tpu.memory_space<vmem>>) attributes {dimension_semantics = [#tpu.dimension_semantics<parallel>], iteration_bounds = array<i64: 1>, scalar_prefetch = 0 : i64, scratch_operands = 0 : i64, tpu.core_type = #tpu.core_type<tc>, window_params = [{transform_indices = @transform_0, window_bounds = array<i64: 64, 16>}, {pipeline_mode = #tpu.pipeline_mode<synchronous>, transform_indices = @transform_1, window_bounds = array<i64: 16, 384>}, {pipeline_mode = #tpu.pipeline_mode<synchronous>, transform_indices = @transform_2, window_bounds = array<i64: 1, 384>}, {transform_indices = @transform_3, window_bounds = array<i64: 64, 384>}]} {
    %c0 = arith.constant 0 : index
    %c0_0 = arith.constant 0 : index
    %0 = vector.load %arg1[%c0, %c0_0] : memref<64x16xf32, #tpu.memory_space<vmem>>, vector<64x16xf32>
    %c0_1 = arith.constant 0 : index
    %c0_2 = arith.constant 0 : index
    %1 = vector.load %arg2[%c0_1, %c0_2] : memref<16x384xf32, #tpu.memory_space<vmem>>, vector<16x384xf32>
    %cst = arith.constant dense<0.000000e+00> : vector<64x384xf32>
    %2 = tpu.matmul %0, %1, %cst {dimension_numbers = #tpu.dot_dimension_numbers<[1], [0], [0], [1], [0, 0, 1, 1], [], []>} : vector<64x16xf32>, vector<16x384xf32>, vector<64x384xf32> -> vector<64x384xf32>
    %c0_3 = arith.constant 0 : index
    %c0_4 = arith.constant 0 : index
    %3 = vector.load %arg3[%c0_3, %c0_4] : memref<1x384xf32, #tpu.memory_space<vmem>>, vector<1x384xf32>
    %4 = vector.broadcast %3 : vector<1x384xf32> to vector<64x384xf32>
    %5 = arith.addf %2, %4 : vector<64x384xf32>
    %c0_5 = arith.constant 0 : index
    %c0_6 = arith.constant 0 : index
    %6 = vector.load %arg4[%c0_5, %c0_6] : memref<64x384xf32, #tpu.memory_space<vmem>>, vector<64x384xf32>
    tpu.vector_store %arg4[%c0_5, %c0_6], %5 {strides = array<i32>} : memref<64x384xf32, #tpu.memory_space<vmem>>, vector<64x384xf32>,
    return
  }
  func.func @transform_0(%arg0: i32) -> (i32, i32) {
    %c0_i32 = arith.constant 0 : i32
    %c0_i32_0 = arith.constant 0 : i32
    return %arg0, %c0_i32 : i32, i32
  }
  func.func @transform_1(%arg0: i32) -> (i32, i32) {
    %c0_i32 = arith.constant 0 : i32
    %c0_i32_0 = arith.constant 0 : i32
    %c0_i32_1 = arith.constant 0 : i32
    return %c0_i32, %c0_i32_0 : i32, i32
  }
  func.func @transform_2(%arg0: i32) -> (i32, i32) {
    %c0_i32 = arith.constant 0 : i32
    %c0_i32_0 = arith.constant 0 : i32
    %c0_i32_1 = arith.constant 0 : i32
    return %c0_i32, %c0_i32_0 : i32, i32
  }
  func.func @transform_3(%arg0: i32) -> (i32, i32) {
    %c0_i32 = arith.constant 0 : i32
    %c0_i32_0 = arith.constant 0 : i32
    return %arg0, %c0_i32 : i32, i32
  }
}

</mosaic_0001>

<bundles_post_ra>
// kernel: tpu_custom_call.1
= control target key start
LH: loop header
LB: loop body
LE: loop exit
PB: predicated region body
PF: predicated region fallthrough
CT: control target
= control target key end

     0   :  { %v409_v5 = vmov 0.0   ;;  %vm46_vm0 = vcmask 130048   ;;  %s526_s0 = inlined_call_operand.vmem [shape: f32[64,16], index: 0, kind: input, shape index: {}]   ;;  %s527_s1 = inlined_call_operand.vmem [shape: f32[16,384], index: 1, kind: input, shape index: {}]   ;;  %s528_s2 = inlined_call_operand.vmem [shape: f32[1,384], index: 2, kind: input, shape index: {}]   ;;  %s529_s3 = inlined_call_operand.hbm [shape: f32[64,384], index: 3, kind: output, shape index: {}]  }
   0x1   :  { %v24_v0 = vld [vmem:[%s527_s1 + $0x8] sm:$0xff]  ;;  %v27_v1 = vld [vmem:[%s527_s1 + $0x20] sm:$0xff]  ;;  %v26_v4 = vld [vmem:[%s527_s1 + $0x18] sm:$0xff]  ;;  %135 = vmatprep.mubr.f32.mxu0 %v409_v5  ;;  %171 = vmatprep.mubr.f32.mxu1 %v409_v5 }
   0x2   :  { %v23_v2 = vld [vmem:[%s527_s1] sm:$0xff]  ;;  %v371_v3 = vpack.c.bf16 %v27_v1, %v24_v0  ;;  %v25_v7 = vld [vmem:[%s527_s1 + $0x10] sm:$0xff]  ;;  %v28_v8 = vld [vmem:[%s527_s1 + $0x28] sm:$0xff] }
   0x3   :  { %v373_v6 = vpack.c.bf16 %v26_v4, %v23_v2  ;;  %v375_v9 = vpack.c.bf16 %v28_v8, %v25_v7  ;;  %v15_v10 = vld [vmem:[%s526_s0] sm:$0xff]  ;;  %v21_v11 = vld [vmem:[%s526_s0 + $0x30] sm:$0xff] }
   0x4   :  { %372 = vmatprep.subr.bf16.mxu0 %v371_v3  ;;  %379 = vmatprep.subr.bf16.mxu1 %v371_v3 }
   0x5   :  { %374 = vmatpush1.bf16.msra.mxu0 %v373_v6  ;;  %380 = vmatpush1.bf16.msra.mxu1 %v373_v6 }
   0x6   :  { %376 = vmatprep.subr.bf16.mxu1 %v375_v9 }
   0x7   :  { %8 = vsyncpa [#allocation3], 0  ;;  %v16_v12 = vld [vmem:[%s526_s0 + $0x8] sm:$0xff]  ;;  %v22_v13 = vld [vmem:[%s526_s0 + $0x38] sm:$0xff]  ;;  %v31_v18 = vlaneseq }
   0x8   :  { %329 = vmatmul.mubr.msk.f32.vlgmr.msra.gmra.mrb[0].mxu0 %vm46_vm0, %v15_v10  ;;  %335 = vmatmul.mubr.msk.f32.vlgmr.msra.gmra.mrb[0].mxu1 %vm46_vm0, %v21_v11  ;;  %v17_v14 = vld [vmem:[%s526_s0 + $0x10] sm:$0xff]  ;;  %v18_v15 = vld [vmem:[%s526_s0 + $0x18] sm:$0xff]  ;;  %v19_v16 = vld [vmem:[%s526_s0 + $0x20] sm:$0xff] }
   0x9   :  { %378 = vmatpush3.bf16.msra.mxu1 %v375_v9  ;;  %141 = vmatprep.mubr.f32.mxu0 %v409_v5  ;;  %v20_v17 = vld [vmem:[%s526_s0 + $0x28] sm:$0xff]  ;;  %v32_v19 = vshrl.u32 %v31_v18, 7  ;;  %v29_v21 = vld [vmem:[%s528_s2] sm:$0x7]  ;;  %s410_s0 = smov [#allocation2]  }
   0xa   :  { %177 = vmatprep.mubr.f32.mxu1 %v409_v5  ;;  %s318_s2 = sshll.u32 %s410_s0, 4  ;;  %s319_s2 = int_to_ptr.vmem [resolvable:$true] %s318_s2 }
   0xb   :  { %v33_v20 = vsub.s32 0, %v32_v19  ;;  %v37_v22 = vsub.s32 1, %v32_v19  ;;  %v41_v31 = vsub.s32 2, %v32_v19  ;;  %s385_s14 = scalar_lea.vmem %s319_s2, 3072  ;;  %p390_p1 = scmp.lt.s32.totalorder %s319_s2, %s319_s2 }
   0xc   :  { %330 = vmatmul.mubr.msk.f32.gmra.mrb[2].mxu0 %vm46_vm0, %v16_v12  ;;  %336 = vmatmul.mubr.msk.f32.gmra.mrb[2].mxu1 %vm46_vm0, %v22_v13  ;;  %p386_p0 = scmp.ne.s32.totalorder %s319_s2, %s385_s14  ;;  %p391_p2 = scmp.lt.s32.totalorder %s385_s14, %s385_s14 }
   0xd   :  { %147 = vmatprep.mubr.f32.mxu0 %v409_v5  ;;  %359 = vmatprep.mubr.msk.f32.mxu1 %vm46_vm0, %v15_v10  ;;  %v494_v23 = vrot.slane %v29_v21, %v33_v20  ;;  %v496_v24 = vrot.slane %v29_v21, %v37_v22  ;;  %v42_v40 = vrot.slane %v29_v21, %v41_v31 }
   0xe   :  { %p392_p3 = por %p391_p2, %p390_p1 }
  0x10   :  { %331 = vmatmul.mubr.msk.f32.gmra.mrb[4].mxu0 %vm46_vm0, %v17_v14  ;;  %360 = vmatmul.mubr.msk.f32.vlgmr.msra.gmra.mrb[4].mxu1 %vm46_vm0, %v16_v12  ;;  %p393_p4 = pnand %p392_p3, %p386_p0 }
  0x11   :  { %153 = vmatprep.mubr.f32.mxu0 %v409_v5  ;;  %362 = vmatprep.mubr.msk.f32.mxu1 %vm46_vm0, %v17_v14 }
  0x14   :  { %332 = vmatmul.mubr.msk.f32.gmra.mrb[6].mxu0 %vm46_vm0, %v18_v15  ;;  %363 = vmatmul.mubr.msk.f32.gmra.mrb[6].mxu1 %vm46_vm0, %v18_v15 }
  0x15   :  { %159 = vmatprep.mubr.f32.mxu0 %v409_v5  ;;  %365 = vmatprep.mubr.msk.f32.mxu1 %vm46_vm0, %v19_v16 }
  0x18   :  { %333 = vmatmul.mubr.msk.f32.gmra.mrb[8].mxu0 %vm46_vm0, %v19_v16  ;;  %366 = vmatmul.mubr.msk.f32.gmra.mrb[8].mxu1 %vm46_vm0, %v20_v17 }
  0x19   :  { %165 = vmatprep.mubr.f32.mxu0 %v409_v5  ;;  %368 = vmatprep.mubr.msk.f32.mxu1 %vm46_vm0, %v21_v11 }
  0x1c   :  { %334 = vmatmul.mubr.msk.f32.gmra.mrb[10].mxu0 %vm46_vm0, %v20_v17  ;;  %369 = vmatmul.mubr.msk.f32.gmra.mrb[10].mxu1 %vm46_vm0, %v22_v13 }
  0xdb   :  { %v137_v25 = vpop.f32.mrb[0].mxu0  ;;  %v173_v26 = vpop.f32.mrb[0].mxu1 }
  0xdc   :  { %v138_v27 = vadd.f32 %v137_v25, %v494_v23  ;;  %v174_v28 = vadd.f32 %v173_v26, %v494_v23  ;;  %v139_v29 = vpop.f32.mrb[1].mxu0  ;;  %v175_v30 = vpop.f32.mrb[1].mxu1 }
  0xdd   :  { %v140_v32 = vadd.f32 %v139_v29, %v496_v24  ;;  %v176_v33 = vadd.f32 %v175_v30, %v496_v24 }
  0xde   :  { %289 = vst [vmem:[#allocation2] sm:$0xff] %v138_v27  ;;  %307 = vst [vmem:[#allocation2 + $0x90] sm:$0xff] %v174_v28 }
  0xdf   :  { %290 = vst [vmem:[#allocation2 + $0x8] sm:$0xff] %v140_v32  ;;  %308 = vst [vmem:[#allocation2 + $0x98] sm:$0xff] %v176_v33  ;;  %v143_v34 = vpop.f32.mrb[2].mxu0  ;;  %v179_v35 = vpop.f32.mrb[2].mxu1 }
  0xe0   :  { %v144_v36 = vadd.f32 %v143_v34, %v494_v23  ;;  %v180_v37 = vadd.f32 %v179_v35, %v494_v23  ;;  %v145_v38 = vpop.f32.mrb[3].mxu0  ;;  %v181_v39 = vpop.f32.mrb[3].mxu1 }
  0xe1   :  { %v146_v41 = vadd.f32 %v145_v38, %v496_v24  ;;  %v182_v42 = vadd.f32 %v181_v39, %v496_v24 }
  0xe2   :  { %292 = vst [vmem:[#allocation2 + $0x18] sm:$0xff] %v144_v36  ;;  %310 = vst [vmem:[#allocation2 + $0xa8] sm:$0xff] %v180_v37 }
  0xe3   :  { %293 = vst [vmem:[#allocation2 + $0x20] sm:$0xff] %v146_v41  ;;  %311 = vst [vmem:[#allocation2 + $0xb0] sm:$0xff] %v182_v42  ;;  %v149_v43 = vpop.f32.mrb[4].mxu0  ;;  %v361_v44 = vpop.f32.mrb[4].mxu1 }
  0xe4   :  { %v150_v45 = vadd.f32 %v149_v43, %v494_v23  ;;  %v256_v46 = vadd.f32 %v361_v44, %v42_v40  ;;  %v151_v47 = vpop.f32.mrb[5].mxu0  ;;  %v250_v48 = vpop.f32.mrb[5].mxu1 }
  0xe5   :  { %v152_v49 = vadd.f32 %v151_v47, %v496_v24  ;;  %v251_v50 = vadd.f32 %v250_v48, %v42_v40 }
  0xe6   :  { %295 = vst [vmem:[#allocation2 + $0x30] sm:$0xff] %v150_v45  ;;  %294 = vst [vmem:[#allocation2 + $0x28] sm:$0xff] %v256_v46 }
  0xe7   :  { %296 = vst [vmem:[#allocation2 + $0x38] sm:$0xff] %v152_v49  ;;  %291 = vst [vmem:[#allocation2 + $0x10] sm:$0xff] %v251_v50  ;;  %v155_v51 = vpop.f32.mrb[6].mxu0  ;;  %v364_v52 = vpop.f32.mrb[6].mxu1 }
  0xe8   :  { %v156_v53 = vadd.f32 %v155_v51, %v494_v23  ;;  %v266_v54 = vadd.f32 %v364_v52, %v42_v40  ;;  %v157_v55 = vpop.f32.mrb[7].mxu0  ;;  %v260_v56 = vpop.f32.mrb[7].mxu1 }
  0xe9   :  { %v158_v57 = vadd.f32 %v157_v55, %v496_v24  ;;  %v261_v58 = vadd.f32 %v260_v56, %v42_v40 }
  0xea   :  { %298 = vst [vmem:[#allocation2 + $0x48] sm:$0xff] %v156_v53  ;;  %300 = vst [vmem:[#allocation2 + $0x58] sm:$0xff] %v266_v54 }
  0xeb   :  { %299 = vst [vmem:[#allocation2 + $0x50] sm:$0xff] %v158_v57  ;;  %297 = vst [vmem:[#allocation2 + $0x40] sm:$0xff] %v261_v58  ;;  %v161_v59 = vpop.f32.mrb[8].mxu0  ;;  %v367_v60 = vpop.f32.mrb[8].mxu1 }
  0xec   :  { %v162_v61 = vadd.f32 %v161_v59, %v494_v23  ;;  %v276_v62 = vadd.f32 %v367_v60, %v42_v40  ;;  %v163_v63 = vpop.f32.mrb[9].mxu0  ;;  %v270_v0 = vpop.f32.mrb[9].mxu1 }
  0xed   :  { %v164_v1 = vadd.f32 %v163_v63, %v496_v24  ;;  %v271_v2 = vadd.f32 %v270_v0, %v42_v40 }
  0xee   :  { %301 = vst [vmem:[#allocation2 + $0x60] sm:$0xff] %v162_v61  ;;  %306 = vst [vmem:[#allocation2 + $0x88] sm:$0xff] %v276_v62 }
  0xef   :  { %302 = vst [vmem:[#allocation2 + $0x68] sm:$0xff] %v164_v1  ;;  %303 = vst [vmem:[#allocation2 + $0x70] sm:$0xff] %v271_v2  ;;  %v167_v3 = vpop.f32.mrb[10].mxu0  ;;  %v370_v4 = vpop.f32.mrb[10].mxu1 }
  0xf0   :  { %v168_v5 = vadd.f32 %v167_v3, %v494_v23  ;;  %v286_v6 = vadd.f32 %v370_v4, %v42_v40  ;;  %v169_v7 = vpop.f32.mrb[11].mxu0  ;;  %v280_v8 = vpop.f32.mrb[11].mxu1 }
  0xf1   :  { %v170_v9 = vadd.f32 %v169_v7, %v496_v24  ;;  %v281_v10 = vadd.f32 %v280_v8, %v42_v40 }
  0xf2   :  { %304 = vst [vmem:[#allocation2 + $0x78] sm:$0xff] %v168_v5  ;;  %312 = vst [vmem:[#allocation2 + $0xb8] sm:$0xff] %v286_v6 }
  0xf3   :  { %305 = vst [vmem:[#allocation2 + $0x80] sm:$0xff] %v170_v9  ;;  %309 = vst [vmem:[#allocation2 + $0xa0] sm:$0xff] %v281_v10 }
  0xf4   :  { %396 = shalt.err (!%p393_p4)
}
  0xf5   :  { %s397_s17 = scalar_lea.hbm %s529_s3, 3072 }
  0xf6   :  { %p398_p5 = scmp.ne.s32.totalorder %s529_s3, %s397_s17  ;;  %p401_p6 = scmp.lt.u32.totalorder %s397_s17, %s529_s3 }
  0xf8   :  { %p403_p7 = pnand %p401_p6, %p398_p5 }
  0xfa   :  { %406 = shalt.err (!%p403_p7)
}
  0xfb   :  { %s411_s22 = smov 384   ;;  %s412_s23 = smov 24  }
  0xfc   :  { %324 = dma.vmem_to_hbm [thread:$0]  %s319_s2, 3072, %s529_s3, [#allocation3], %s411_s22, %s411_s22, %s412_s23  }
  0xfd   :  { %407 = dma.done.wait [#allocation3], 3072  }
  0xfe   :  { %408 = vsyncadd [#allocation3], 4294964224 }
  0xff   :  { %328 = vsyncpa [#allocation3], 1 }

</bundles_post_ra>
